<compile_context>
chip_gen: v6e
topology: v6e:2x2x1
jax: 0.10.0
libtpu: 0.0.40
codegen_flags: <defaults>
</compile_context>

<pallas_src>
import jax
import jax.numpy as jnp
from jax.experimental import pallas as pl
from jax.experimental.pallas import tpu as pltpu

H1, H2, H3 = 1000, 200, 1
H1P, H2P, H3P = 1024, 256, 128   # padded to lane multiples of 128


def _round_up(x: int, m: int) -> int:
    return (x + m - 1) // m * m


def _mlp_kernel(x_ref, w0_ref, b0_ref, w1_ref, b1_ref, w2_ref, b2_ref, o_ref):
    # Layer 0: Linear(D -> 1000) + ReLU   (bf16 matmul, f32 accumulate)
    h0 = jnp.dot(x_ref[...], w0_ref[...], preferred_element_type=jnp.float32)
    h0 = jnp.maximum(h0 + b0_ref[...], 0.0).astype(jnp.bfloat16)
    # Layer 1: Linear(1000 -> 200) + ReLU
    h1 = jnp.dot(h0, w1_ref[...], preferred_element_type=jnp.float32)
    h1 = jnp.maximum(h1 + b1_ref[...], 0.0).astype(jnp.bfloat16)
    # Output: Linear(200 -> 1)
    out = jnp.dot(h1, w2_ref[...], preferred_element_type=jnp.float32)
    o_ref[...] = (out + b2_ref[...]).astype(o_ref.dtype)


def pack_discriminator_params(params, d_in: int):
    """One-time packing: transpose (out,in)->(in,out), zero-pad, cast to bf16."""
    (w0, b0), (w1, b1), (w2, b2) = params
    Dp = _round_up(d_in, 128)
    bf16, f32 = jnp.bfloat16, jnp.float32

    w0p = jnp.pad(w0.T.astype(bf16), ((0, Dp - d_in), (0, H1P - H1)))
    b0p = jnp.pad(b0.astype(f32), (0, H1P - H1)).reshape(1, H1P)
    w1p = jnp.pad(w1.T.astype(bf16), ((0, H1P - H1), (0, H2P - H2)))
    b1p = jnp.pad(b1.astype(f32), (0, H2P - H2)).reshape(1, H2P)
    w2p = jnp.pad(w2.T.astype(bf16), ((0, H2P - H2), (0, H3P - H3)))
    b2p = jnp.pad(b2.astype(f32), (0, H3P - H3)).reshape(1, H3P)
    return (w0p, b0p, w1p, b1p, w2p, b2p)


@jax.jit
def discriminator_forward(x, packed):
    """x: (B, shared_dim + exclusive_dim) float32 -> (B, 1) float32."""
    w0p, b0p, w1p, b1p, w2p, b2p = packed
    B, D_in = x.shape
    Dp = w0p.shape[0]

    # Batch tile: fill the MXU (256 rows) for large B; minimal 8-aligned tile
    # for tiny B so a batch of 2 isn't padded up to 256 rows.
    TB = 256 if B > 256 else _round_up(max(B, 8), 8)
    Bp = _round_up(max(B, 8), TB)
    n_b = Bp // TB

    # Per-call padding/cast of the streaming activations only (weights are
    # already packed & resident).
    xp = jnp.pad(x.astype(jnp.bfloat16), ((0, Bp - B), (0, Dp - D_in)))

    resident = lambda shape: pl.BlockSpec(shape, lambda i: (0, 0))

    out_padded = pl.pallas_call(
        _mlp_kernel,
        out_shape=jax.ShapeDtypeStruct((Bp, H3P), jnp.float32),
        grid=(n_b,),
        in_specs=[
            pl.BlockSpec((TB, Dp), lambda i: (i, 0)),   # x: streamed per tile
            resident((Dp, H1P)), resident((1, H1P)),    # weights/biases stay put
            resident((H1P, H2P)), resident((1, H2P)),
            resident((H2P, H3P)), resident((1, H3P)),
        ],
        out_specs=pl.BlockSpec((TB, H3P), lambda i: (i, 0)),
        compiler_params=pltpu.CompilerParams(
            dimension_semantics=("parallel",),
            vmem_limit_bytes=32 << 20,
        ),
    )(xp, w0p, b0p, w1p, b1p, w2p, b2p)

    return out_padded[:B, :H3]


def init_discriminator_params(key, shared_dim: int, exclusive_dim: int):
    """Deterministic init matching nn.Linear default (U[-1/sqrt(fan_in), +])."""
    dims = [(shared_dim + exclusive_dim, 1000), (1000, 200), (200, 1)]
    params = []
    for (fan_in, fan_out) in dims:
        key, kw, kb = jax.random.split(key, 3)
        bound = 1.0 / jnp.sqrt(jnp.float32(fan_in))
        w = jax.random.uniform(kw, (fan_out, fan_in), jnp.float32, -bound, bound)
        b = jax.random.uniform(kb, (fan_out,), jnp.float32, -bound, bound)
        params.append((w, b))
    return params


def _reference_forward(x, params):
    (w0, b0), (w1, b1), (w2, b2) = params
    h = jnp.maximum(x @ w0.T + b0, 0.0)
    h = jnp.maximum(h @ w1.T + b1, 0.0)
    return h @ w2.T + b2


if __name__ == "__main__":
    shared_dim, exclusive_dim = 16, 16
    batch = 2

    key = jax.random.PRNGKey(0)
    key, kx = jax.random.split(key)
    x = jax.random.normal(kx, (batch, shared_dim + exclusive_dim), jnp.float32)
    params = init_discriminator_params(key, shared_dim, exclusive_dim)

    # Pack weights once (outside the per-call forward path).
    packed = jax.block_until_ready(
        pack_discriminator_params(params, shared_dim + exclusive_dim))

    out = discriminator_forward(x, packed)
    out = jax.block_until_ready(out)

    ref = _reference_forward(x, params)
    assert out.shape == (batch, 1), out.shape
    # bf16 matmul inputs (f32 accumulation) -> slightly looser tolerance.
    assert jnp.allclose(out, ref, atol=3e-2, rtol=3e-2), (out, ref)
    print("KERNEL_OK")
</pallas_src>

<mosaic_0001>
module attributes {stable_mosaic.version = 11 : i64} {
  func.func @_mlp_kernel(%arg0: i32, %arg1: memref<8x128xbf16, #tpu.memory_space<vmem>>, %arg2: memref<128x1024xbf16, #tpu.memory_space<vmem>>, %arg3: memref<1x1024xf32, #tpu.memory_space<vmem>>, %arg4: memref<1024x256xbf16, #tpu.memory_space<vmem>>, %arg5: memref<1x256xf32, #tpu.memory_space<vmem>>, %arg6: memref<256x128xbf16, #tpu.memory_space<vmem>>, %arg7: memref<1x128xf32, #tpu.memory_space<vmem>>, %arg8: memref<8x128xf32, #tpu.memory_space<vmem>>) attributes {dimension_semantics = [#tpu.dimension_semantics<parallel>], iteration_bounds = array<i64: 1>, scalar_prefetch = 0 : i64, scratch_operands = 0 : i64, tpu.core_type = #tpu.core_type<tc>, window_params = [{transform_indices = @transform_0, window_bounds = array<i64: 8, 128>}, {pipeline_mode = #tpu.pipeline_mode<synchronous>, transform_indices = @transform_1, window_bounds = array<i64: 128, 1024>}, {pipeline_mode = #tpu.pipeline_mode<synchronous>, transform_indices = @transform_2, window_bounds = array<i64: 1, 1024>}, {pipeline_mode = #tpu.pipeline_mode<synchronous>, transform_indices = @transform_3, window_bounds = array<i64: 1024, 256>}, {pipeline_mode = #tpu.pipeline_mode<synchronous>, transform_indices = @transform_4, window_bounds = array<i64: 1, 256>}, {pipeline_mode = #tpu.pipeline_mode<synchronous>, transform_indices = @transform_5, window_bounds = array<i64: 256, 128>}, {pipeline_mode = #tpu.pipeline_mode<synchronous>, transform_indices = @transform_6, window_bounds = array<i64: 1, 128>}, {transform_indices = @transform_7, window_bounds = array<i64: 8, 128>}]} {
    %c0 = arith.constant 0 : index
    %c0_0 = arith.constant 0 : index
    %0 = vector.load %arg1[%c0, %c0_0] : memref<8x128xbf16, #tpu.memory_space<vmem>>, vector<8x128xbf16>
    %c0_1 = arith.constant 0 : index
    %c0_2 = arith.constant 0 : index
    %1 = vector.load %arg2[%c0_1, %c0_2] : memref<128x1024xbf16, #tpu.memory_space<vmem>>, vector<128x1024xbf16>
    %cst = arith.constant dense<0.000000e+00> : vector<8x1024xf32>
    %2 = tpu.matmul %0, %1, %cst {dimension_numbers = #tpu.dot_dimension_numbers<[1], [0], [0], [1], [0, 0, 1, 1], [], []>} : vector<8x128xbf16>, vector<128x1024xbf16>, vector<8x1024xf32> -> vector<8x1024xf32>
    %c0_3 = arith.constant 0 : index
    %c0_4 = arith.constant 0 : index
    %3 = vector.load %arg3[%c0_3, %c0_4] : memref<1x1024xf32, #tpu.memory_space<vmem>>, vector<1x1024xf32>
    %4 = vector.broadcast %3 : vector<1x1024xf32> to vector<8x1024xf32>
    %5 = arith.addf %2, %4 : vector<8x1024xf32>
    %cst_5 = arith.constant 0.000000e+00 : f32
    %6 = vector.broadcast %cst_5 : f32 to vector<8x1024xf32>
    %7 = arith.maximumf %5, %6 : vector<8x1024xf32>
    %8 = arith.truncf %7 : vector<8x1024xf32> to vector<8x1024xbf16>
    %c0_6 = arith.constant 0 : index
    %c0_7 = arith.constant 0 : index
    %9 = vector.load %arg4[%c0_6, %c0_7] : memref<1024x256xbf16, #tpu.memory_space<vmem>>, vector<1024x256xbf16>
    %cst_8 = arith.constant dense<0.000000e+00> : vector<8x256xf32>
    %10 = tpu.matmul %8, %9, %cst_8 {dimension_numbers = #tpu.dot_dimension_numbers<[1], [0], [0], [1], [0, 0, 1, 1], [], []>} : vector<8x1024xbf16>, vector<1024x256xbf16>, vector<8x256xf32> -> vector<8x256xf32>
    %c0_9 = arith.constant 0 : index
    %c0_10 = arith.constant 0 : index
    %11 = vector.load %arg5[%c0_9, %c0_10] : memref<1x256xf32, #tpu.memory_space<vmem>>, vector<1x256xf32>
    %12 = vector.broadcast %11 : vector<1x256xf32> to vector<8x256xf32>
    %13 = arith.addf %10, %12 : vector<8x256xf32>
    %cst_11 = arith.constant 0.000000e+00 : f32
    %14 = vector.broadcast %cst_11 : f32 to vector<8x256xf32>
    %15 = arith.maximumf %13, %14 : vector<8x256xf32>
    %16 = arith.truncf %15 : vector<8x256xf32> to vector<8x256xbf16>
    %c0_12 = arith.constant 0 : index
    %c0_13 = arith.constant 0 : index
    %17 = vector.load %arg6[%c0_12, %c0_13] : memref<256x128xbf16, #tpu.memory_space<vmem>>, vector<256x128xbf16>
    %cst_14 = arith.constant dense<0.000000e+00> : vector<8x128xf32>
    %18 = tpu.matmul %16, %17, %cst_14 {dimension_numbers = #tpu.dot_dimension_numbers<[1], [0], [0], [1], [0, 0, 1, 1], [], []>} : vector<8x256xbf16>, vector<256x128xbf16>, vector<8x128xf32> -> vector<8x128xf32>
    %c0_15 = arith.constant 0 : index
    %c0_16 = arith.constant 0 : index
    %19 = vector.load %arg7[%c0_15, %c0_16] : memref<1x128xf32, #tpu.memory_space<vmem>>, vector<1x128xf32>
    %20 = vector.broadcast %19 : vector<1x128xf32> to vector<8x128xf32>
    %21 = arith.addf %18, %20 : vector<8x128xf32>
    %c0_17 = arith.constant 0 : index
    %c0_18 = arith.constant 0 : index
    %22 = vector.load %arg8[%c0_17, %c0_18] : memref<8x128xf32, #tpu.memory_space<vmem>>, vector<8x128xf32>
    tpu.vector_store %arg8[%c0_17, %c0_18], %21 {strides = array<i32>} : memref<8x128xf32, #tpu.memory_space<vmem>>, vector<8x128xf32>,
    return
  }
  func.func @transform_0(%arg0: i32) -> (i32, i32) {
    %c0_i32 = arith.constant 0 : i32
    %c0_i32_0 = arith.constant 0 : i32
    return %arg0, %c0_i32 : i32, i32
  }
  func.func @transform_1(%arg0: i32) -> (i32, i32) {
    %c0_i32 = arith.constant 0 : i32
    %c0_i32_0 = arith.constant 0 : i32
    %c0_i32_1 = arith.constant 0 : i32
    return %c0_i32, %c0_i32_0 : i32, i32
  }
  func.func @transform_2(%arg0: i32) -> (i32, i32) {
    %c0_i32 = arith.constant 0 : i32
    %c0_i32_0 = arith.constant 0 : i32
    %c0_i32_1 = arith.constant 0 : i32
    return %c0_i32, %c0_i32_0 : i32, i32
  }
  func.func @transform_3(%arg0: i32) -> (i32, i32) {
    %c0_i32 = arith.constant 0 : i32
    %c0_i32_0 = arith.constant 0 : i32
    %c0_i32_1 = arith.constant 0 : i32
    return %c0_i32, %c0_i32_0 : i32, i32
  }
  func.func @transform_4(%arg0: i32) -> (i32, i32) {
    %c0_i32 = arith.constant 0 : i32
    %c0_i32_0 = arith.constant 0 : i32
    %c0_i32_1 = arith.constant 0 : i32
    return %c0_i32, %c0_i32_0 : i32, i32
  }
  func.func @transform_5(%arg0: i32) -> (i32, i32) {
    %c0_i32 = arith.constant 0 : i32
    %c0_i32_0 = arith.constant 0 : i32
    %c0_i32_1 = arith.constant 0 : i32
    return %c0_i32, %c0_i32_0 : i32, i32
  }
  func.func @transform_6(%arg0: i32) -> (i32, i32) {
    %c0_i32 = arith.constant 0 : i32
    %c0_i32_0 = arith.constant 0 : i32
    %c0_i32_1 = arith.constant 0 : i32
    return %c0_i32, %c0_i32_0 : i32, i32
  }
  func.func @transform_7(%arg0: i32) -> (i32, i32) {
    %c0_i32 = arith.constant 0 : i32
    %c0_i32_0 = arith.constant 0 : i32
    return %arg0, %c0_i32 : i32, i32
  }
}

</mosaic_0001>

<bundles_post_ra>
// kernel: discriminator_forward.1
= control target key start
LH: loop header
LB: loop body
LE: loop exit
PB: predicated region body
PF: predicated region fallthrough
CT: control target
= control target key end

     0   :  { %12 = vsyncpa [#allocation3], 0  ;;  %s2436_s0 = inlined_call_operand.vmem [shape: bf16[8,128], index: 0, kind: input, shape index: {}]   ;;  %s2437_s1 = inlined_call_operand.hbm [shape: bf16[128,1024], index: 1, kind: input, shape index: {}]   ;;  %s2438_s2 = inlined_call_operand.vmem [shape: f32[1,1024], index: 2, kind: input, shape index: {}]   ;;  %s2439_s3 = inlined_call_operand.hbm [shape: bf16[1024,256], index: 3, kind: input, shape index: {}]   ;;  %s2440_s4 = inlined_call_operand.vmem [shape: f32[1,256], index: 4, kind: input, shape index: {}]   ;;  %s2441_s5 = inlined_call_operand.hbm [shape: bf16[256,128], index: 5, kind: input, shape index: {}]   ;;  %s2442_s6 = inlined_call_operand.vmem [shape: f32[1,128], index: 6, kind: input, shape index: {}]   ;;  %s2443_s7 = inlined_call_operand.vmem [shape: f32[8,128], index: 7, kind: output, shape index: {}]  }
   0x1   :  { %13 = vsyncpa [#allocation5], 0  ;;  %s2318_s24 = smov [#allocation4]  }
   0x2   :  { %s35_s25 = sshll.u32 %s2318_s24, 4  ;;  %s36_s25 = int_to_ptr.vmem [resolvable:$true] %s35_s25 }
   0x3   :  { %s2262_s26 = scalar_lea.vmem %s36_s25, 16384  ;;  %p2267_p1 = scmp.lt.s32.totalorder %s36_s25, %s36_s25 }
   0x4   :  { %p2263_p0 = scmp.ne.s32.totalorder %s36_s25, %s2262_s26  ;;  %p2268_p2 = scmp.lt.s32.totalorder %s2262_s26, %s2262_s26 }
   0x6   :  { %p2269_p3 = por %p2268_p2, %p2267_p1 }
   0x8   :  { %p2270_p4 = pnand %p2269_p3, %p2263_p0 }
   0xa   :  { %2273 = shalt.err (!%p2270_p4)
}
   0xb   :  { %s2319_s27 = smov 128   ;;  %s2320_s28 = smov 8  }
   0xc   :  { %41 = dma.hbm_to_vmem [thread:$0]  %s2439_s3, 16384, %s36_s25, [#allocation5], %s2319_s27, %s2319_s27, %s2320_s28  }
   0xd   :  { %s2321_s8 = smov [#allocation2]  }
   0xe   :  { %s21_s9 = sshll.u32 %s2321_s8, 4  ;;  %s22_s9 = int_to_ptr.vmem [resolvable:$true] %s21_s9 }
   0xf   :  { %s2282_s10 = scalar_lea.vmem %s22_s9, 8192  ;;  %p2287_p6 = scmp.lt.s32.totalorder %s22_s9, %s22_s9 }
  0x10   :  { %p2283_p5 = scmp.ne.s32.totalorder %s22_s9, %s2282_s10  ;;  %p2288_p7 = scmp.lt.s32.totalorder %s2282_s10, %s2282_s10 }
  0x12   :  { %p2289_p8 = por %p2288_p7, %p2287_p6 }
  0x14   :  { %p2290_p9 = pnand %p2289_p8, %p2283_p5 }
  0x16   :  { %2293 = shalt.err (!%p2290_p9)
}
  0x17   :  { %s2322_s11 = smov 512   ;;  %s2323_s12 = smov 32  }
  0x18   :  { %27 = dma.hbm_to_vmem [thread:$0]  %s2437_s1, 8192, %s22_s9, [#allocation3], %s2322_s11, %s2322_s11, %s2323_s12  }
  0x19   :  { %s2324_s15 = smov [#allocation6]  }
  0x1a   :  { %s49_s16 = sshll.u32 %s2324_s15, 4  ;;  %s50_s16 = int_to_ptr.vmem [resolvable:$true] %s49_s16 }
  0x1b   :  { %s2302_s3 = scalar_lea.vmem %s50_s16, 2048  ;;  %p2307_p11 = scmp.lt.s32.totalorder %s50_s16, %s50_s16 }
  0x1c   :  { %p2303_p10 = scmp.ne.s32.totalorder %s50_s16, %s2302_s3  ;;  %p2308_p12 = scmp.lt.s32.totalorder %s2302_s3, %s2302_s3 }
  0x1e   :  { %p2309_p13 = por %p2308_p12, %p2307_p11 }
  0x20   :  { %p2310_p0 = pnand %p2309_p13, %p2303_p10 }
  0x22   :  { %2313 = shalt.err (!%p2310_p0)
}
  0x23   :  { %s2325_s17 = smov 64   ;;  %s2326_s18 = smov 4  }
  0x24   :  { %55 = dma.hbm_to_vmem [thread:$0]  %s2441_s5, 2048, %s50_s16, [#allocation5], %s2325_s17, %s2325_s17, %s2326_s18  }
  0x25   :  { %2314 = dma.done.wait [#allocation3], 8192  }
  0x26   :  { %2315 = vsyncadd [#allocation3], 4294959104 }
  0x27   :  { %2316 = dma.done.wait [#allocation5], 18432  }
  0x28   :  { %2317 = vsyncadd [#allocation5], 4294948864  ;;  %v2327_v0 = vmov 0   ;;  %v125_v1 = vld [vmem:[#allocation2 + $0x1c0] sm:$0xff]  ;;  %v126_v3 = vld [vmem:[#allocation2 + $0x1c8] sm:$0xff] }
  0x29   :  { %527 = vmatprep.mubr.bf16.mxu0 %v2327_v0  ;;  %568 = vmatprep.mubr.bf16.mxu1 %v2327_v0  ;;  %v129_v2 = vld [vmem:[#allocation2 + $0x1e0] sm:$0xff]  ;;  %v130_v5 = vld [vmem:[#allocation2 + $0x1e8] sm:$0xff]  ;;  %v127_v62 = vld [vmem:[#allocation2 + $0x1d0] sm:$0xff] }
  0x2a   :  { %v1862_v4 = vcombine.high %v125_v1, %v129_v2  ;;  %v1861_v6 = vcombine.low %v125_v1, %v129_v2  ;;  %v117_v7 = vld [vmem:[#allocation2 + $0x180] sm:$0xff]  ;;  %v1864_v9 = vcombine.high %v126_v3, %v130_v5  ;;  %v1863_v10 = vcombine.low %v126_v3, %v130_v5  ;;  %v118_v12 = vld [vmem:[#allocation2 + $0x188] sm:$0xff]  ;;  %v131_v1 = vld [vmem:[#allocation2 + $0x1f0] sm:$0xff] }
  0x2b   :  { %v121_v8 = vld [vmem:[#allocation2 + $0x1a0] sm:$0xff]  ;;  %v122_v13 = vld [vmem:[#allocation2 + $0x1a8] sm:$0xff]  ;;  %v128_v2 = vld [vmem:[#allocation2 + $0x1d8] sm:$0xff] }
  0x2c   :  { %v1854_v11 = vcombine.high %v117_v7, %v121_v8  ;;  %v109_v14 = vld [vmem:[#allocation2 + $0x140] sm:$0xff]  ;;  %495 = vmatprep.subr.bf16.mxu0 %v1862_v4  ;;  %v1856_v15 = vcombine.high %v118_v12, %v122_v13  ;;  %v110_v17 = vld [vmem:[#allocation2 + $0x148] sm:$0xff]  ;;  %536 = vmatprep.subr.bf16.mxu1 %v1864_v9  ;;  %v1853_v19 = vcombine.low %v117_v7, %v121_v8  ;;  %v132_v3 = vld [vmem:[#allocation2 + $0x1f8] sm:$0xff] }
  0x2d   :  { %v113_v16 = vld [vmem:[#allocation2 + $0x160] sm:$0xff]  ;;  %v114_v18 = vld [vmem:[#allocation2 + $0x168] sm:$0xff]  ;;  %496 = vmatpush1.bf16.msra.mxu0 %v1861_v6  ;;  %537 = vmatpush1.bf16.msra.mxu1 %v1863_v10  ;;  %v1855_v20 = vcombine.low %v118_v12, %v122_v13  ;;  %v1866_v6 = vcombine.high %v127_v62, %v131_v1  ;;  %v119_v7 = vld [vmem:[#allocation2 + $0x190] sm:$0xff]  ;;  %v1868_v8 = vcombine.high %v128_v2, %v132_v3 }
  0x2e   :  { %497 = vmatprep.subr.bf16.mxu0 %v1854_v11  ;;  %v1846_v21 = vcombine.high %v109_v14, %v113_v16  ;;  %538 = vmatprep.subr.bf16.mxu1 %v1856_v15  ;;  %v1848_v22 = vcombine.high %v110_v17, %v114_v18  ;;  %v101_v23 = vld [vmem:[#allocation2 + $0x100] sm:$0xff]  ;;  %v102_v25 = vld [vmem:[#allocation2 + $0x108] sm:$0xff]  ;;  %v1845_v27 = vcombine.low %v109_v14, %v113_v16  ;;  %v123_v9 = vld [vmem:[#allocation2 + $0x1b0] sm:$0xff] }
  0x2f   :  { %v105_v24 = vld [vmem:[#allocation2 + $0x120] sm:$0xff]  ;;  %v106_v26 = vld [vmem:[#allocation2 + $0x128] sm:$0xff]  ;;  %v1847_v28 = vcombine.low %v110_v17, %v114_v18  ;;  %v120_v10 = vld [vmem:[#allocation2 + $0x198] sm:$0xff]  ;;  %v1865_v13 = vcombine.low %v127_v62, %v131_v1  ;;  %v1867_v14 = vcombine.low %v128_v2, %v132_v3  ;;  %v1858_v15 = vcombine.high %v119_v7, %v123_v9 }
  0x30   :  { %v1838_v29 = vcombine.high %v101_v23, %v105_v24  ;;  %v1840_v30 = vcombine.high %v102_v25, %v106_v26  ;;  %v93_v31 = vld [vmem:[#allocation2 + $0xc0] sm:$0xff]  ;;  %v94_v33 = vld [vmem:[#allocation2 + $0xc8] sm:$0xff]  ;;  %v1837_v35 = vcombine.low %v101_v23, %v105_v24  ;;  %v1839_v36 = vcombine.low %v102_v25, %v106_v26  ;;  %v124_v11 = vld [vmem:[#allocation2 + $0x1b8] sm:$0xff] }
  0x31   :  { %498 = vmatpush1.bf16.msra.mxu0 %v1853_v19  ;;  %539 = vmatpush1.bf16.msra.mxu1 %v1855_v20  ;;  %v97_v32 = vld [vmem:[#allocation2 + $0xe0] sm:$0xff]  ;;  %v98_v34 = vld [vmem:[#allocation2 + $0xe8] sm:$0xff]  ;;  %v111_v16 = vld [vmem:[#allocation2 + $0x150] sm:$0xff]  ;;  %v1860_v17 = vcombine.high %v120_v10, %v124_v11 }
  0x32   :  { %499 = vmatprep.subr.bf16.mxu0 %v1846_v21  ;;  %540 = vmatprep.subr.bf16.mxu1 %v1848_v22  ;;  %v1830_v37 = vcombine.high %v93_v31, %v97_v32  ;;  %v1832_v38 = vcombine.high %v94_v33, %v98_v34  ;;  %v85_v39 = vld [vmem:[#allocation2 + $0x80] sm:$0xff]  ;;  %v86_v41 = vld [vmem:[#allocation2 + $0x88] sm:$0xff]  ;;  %v1829_v43 = vcombine.low %v93_v31, %v97_v32  ;;  %v115_v18 = vld [vmem:[#allocation2 + $0x170] sm:$0xff] }
  0x33   :  { %v89_v40 = vld [vmem:[#allocation2 + $0xa0] sm:$0xff]  ;;  %v90_v42 = vld [vmem:[#allocation2 + $0xa8] sm:$0xff]  ;;  %v1831_v44 = vcombine.low %v94_v33, %v98_v34  ;;  %v112_v19 = vld [vmem:[#allocation2 + $0x158] sm:$0xff]  ;;  %v1857_v21 = vcombine.low %v119_v7, %v123_v9  ;;  %v1859_v22 = vcombine.low %v120_v10, %v124_v11  ;;  %v1850_v23 = vcombine.high %v111_v16, %v115_v18 }
  0x34   :  { %v1822_v45 = vcombine.high %v85_v39, %v89_v40  ;;  %v1824_v46 = vcombine.high %v86_v41, %v90_v42  ;;  %v77_v47 = vld [vmem:[#allocation2 + $0x40] sm:$0xff]  ;;  %v78_v49 = vld [vmem:[#allocation2 + $0x48] sm:$0xff]  ;;  %v1821_v51 = vcombine.low %v85_v39, %v89_v40  ;;  %v1823_v52 = vcombine.low %v86_v41, %v90_v42  ;;  %v116_v20 = vld [vmem:[#allocation2 + $0x178] sm:$0xff] }
  0x35   :  { %500 = vmatpush1.bf16.msra.mxu0 %v1845_v27  ;;  %541 = vmatpush1.bf16.msra.mxu1 %v1847_v28  ;;  %v81_v48 = vld [vmem:[#allocation2 + $0x60] sm:$0xff]  ;;  %v82_v50 = vld [vmem:[#allocation2 + $0x68] sm:$0xff]  ;;  %v103_v24 = vld [vmem:[#allocation2 + $0x110] sm:$0xff]  ;;  %v1852_v25 = vcombine.high %v112_v19, %v116_v20 }
  0x36   :  { %501 = vmatprep.subr.bf16.mxu0 %v1838_v29  ;;  %542 = vmatprep.subr.bf16.mxu1 %v1840_v30  ;;  %v1814_v53 = vcombine.high %v77_v47, %v81_v48  ;;  %v69_v54 = vld [vmem:[#allocation2] sm:$0xff]  ;;  %v1816_v55 = vcombine.high %v78_v49, %v82_v50  ;;  %v70_v57 = vld [vmem:[#allocation2 + $0x8] sm:$0xff]  ;;  %v1813_v59 = vcombine.low %v77_v47, %v81_v48  ;;  %v107_v26 = vld [vmem:[#allocation2 + $0x130] sm:$0xff] }
  0x37   :  { %v73_v56 = vld [vmem:[#allocation2 + $0x20] sm:$0xff]  ;;  %v74_v58 = vld [vmem:[#allocation2 + $0x28] sm:$0xff]  ;;  %v1815_v60 = vcombine.low %v78_v49, %v82_v50  ;;  %v104_v27 = vld [vmem:[#allocation2 + $0x118] sm:$0xff]  ;;  %v1849_v29 = vcombine.low %v111_v16, %v115_v18  ;;  %v1851_v30 = vcombine.low %v112_v19, %v116_v20  ;;  %v1842_v31 = vcombine.high %v103_v24, %v107_v26 }
  0x38   :  { %v1806_v61 = vcombine.high %v69_v54, %v73_v56  ;;  %v1808_v63 = vcombine.high %v70_v57, %v74_v58  ;;  %v1805_v4 = vcombine.low %v69_v54, %v73_v56  ;;  %v1807_v5 = vcombine.low %v70_v57, %v74_v58  ;;  %v2382_v12 = vld [vmem:[%s2436_s0] sm:$0xf]  ;;  %v108_v28 = vld [vmem:[#allocation2 + $0x138] sm:$0xff]  ;;  %v95_v32 = vld [vmem:[#allocation2 + $0xd0] sm:$0xff] }
  0x39   :  { %502 = vmatpush1.bf16.msra.mxu0 %v1837_v35  ;;  %543 = vmatpush1.bf16.msra.mxu1 %v1839_v36  ;;  %v1844_v33 = vcombine.high %v104_v27, %v108_v28  ;;  %v99_v34 = vld [vmem:[#allocation2 + $0xf0] sm:$0xff]  ;;  %v96_v35 = vld [vmem:[#allocation2 + $0xd8] sm:$0xff]  ;;  %v2054_v7 = vld [vmem:[#allocation4 + $0x64] ss:$8 sps:$4 sm:$0xff]  }
  0x3a   :  { %503 = vmatprep.subr.bf16.mxu0 %v1830_v37  ;;  %544 = vmatprep.subr.bf16.mxu1 %v1832_v38  ;;  %v100_v36 = vld [vmem:[#allocation2 + $0xf8] sm:$0xff]  ;;  %v1841_v37 = vcombine.low %v103_v24, %v107_v26  ;;  %v1843_v38 = vcombine.low %v104_v27, %v108_v28  ;;  %v1834_v39 = vcombine.high %v95_v32, %v99_v34  ;;  %v87_v40 = vld [vmem:[#allocation2 + $0x90] sm:$0xff]  ;;  %v2052_v9 = vld [vmem:[#allocation4 + $0x60] ss:$8 sps:$4 sm:$0xff]  }
  0x3b   :  { %v91_v41 = vld [vmem:[#allocation2 + $0xb0] sm:$0xff]  ;;  %v88_v42 = vld [vmem:[#allocation2 + $0x98] sm:$0xff]  ;;  %v2055_v10 = vld [vmem:[#allocation4 + $0x160] ss:$8 sps:$4 sm:$0xff]  }
  0x3c   :  { %v79_v47 = vld [vmem:[#allocation2 + $0x50] sm:$0xff]  ;;  %v80_v50 = vld [vmem:[#allocation2 + $0x58] sm:$0xff]  ;;  %v2066_v16 = vld [vmem:[#allocation4 + $0x44] ss:$8 sps:$4 sm:$0xff]  }
  0x3d   :  { %504 = vmatpush1.bf16.msra.mxu0 %v1829_v43  ;;  %545 = vmatpush1.bf16.msra.mxu1 %v1831_v44  ;;  %v92_v43 = vld [vmem:[#allocation2 + $0xb8] sm:$0xff]  ;;  %v1833_v44 = vcombine.low %v95_v32, %v99_v34  ;;  %v83_v49 = vld [vmem:[#allocation2 + $0x70] sm:$0xff]  ;;  %v2064_v18 = vld [vmem:[#allocation4 + $0x40] ss:$8 sps:$4 sm:$0xff]  }
  0x3e   :  { %505 = vmatprep.subr.bf16.mxu0 %v1822_v45  ;;  %546 = vmatprep.subr.bf16.mxu1 %v1824_v46  ;;  %v1835_v45 = vcombine.low %v96_v35, %v100_v36  ;;  %v1826_v46 = vcombine.high %v87_v40, %v91_v41  ;;  %v1828_v48 = vcombine.high %v88_v42, %v92_v43  ;;  %v75_v57 = vld [vmem:[#allocation2 + $0x30] sm:$0xff]  ;;  %v72_v58 = vld [vmem:[#allocation2 + $0x18] sm:$0xff]  ;;  %v2067_v19 = vld [vmem:[#allocation4 + $0x140] ss:$8 sps:$4 sm:$0xff]  }
  0x3f   :  { %v1818_v54 = vcombine.high %v79_v47, %v83_v49  ;;  %v2048_v1 = vld [vmem:[#allocation4 + $0x74] ss:$8 sps:$4 sm:$0xff]   ;;  %v2081_v24 = vld [vmem:[#allocation4 + $0x124] ss:$8 sps:$4 sm:$0xff]   ;;  %v2079_v26 = vld [vmem:[#allocation4 + $0x120] ss:$8 sps:$4 sm:$0xff]  }
  0x40   :  { %v2051_v3 = vld [vmem:[#allocation4 + $0x174] ss:$8 sps:$4 sm:$0xff]   ;;  %v2093_v32 = vld [vmem:[#allocation4 + $0x104] ss:$8 sps:$4 sm:$0xff]   ;;  %v2091_v34 = vld [vmem:[#allocation4 + $0x100] ss:$8 sps:$4 sm:$0xff]  }
  0x41   :  { %506 = vmatpush1.bf16.msra.mxu0 %v1821_v51  ;;  %547 = vmatpush1.bf16.msra.mxu1 %v1823_v52  ;;  %v84_v51 = vld [vmem:[#allocation2 + $0x78] sm:$0xff]  ;;  %v1825_v52 = vcombine.low %v87_v40, %v91_v41  ;;  %v2105_v40 = vld [vmem:[#allocation4 + $0x1e4] ss:$8 sps:$4 sm:$0xff]   ;;  %v2103_v41 = vld [vmem:[#allocation4 + $0x1e0] ss:$8 sps:$4 sm:$0xff]  }
  0x42   :  { %507 = vmatprep.subr.bf16.mxu0 %v1814_v53  ;;  %548 = vmatprep.subr.bf16.mxu1 %v1816_v55  ;;  %v1827_v53 = vcombine.low %v88_v42, %v92_v43  ;;  %v71_v55 = vld [vmem:[#allocation2 + $0x10] sm:$0xff]  ;;  %v1820_v56 = vcombine.high %v80_v50, %v84_v51 }
  0x43   :  { %v1810_v62 = vcombine.high %v71_v55, %v75_v57  ;;  %v1809_v2 = vcombine.low %v71_v55, %v75_v57  ;;  %v2060_v11 = vld [vmem:[#allocation4 + $0x54] ss:$8 sps:$4 sm:$0xff]   ;;  %v2129_v55 = vld [vmem:[#allocation4 + $0x1a4] ss:$8 sps:$4 sm:$0xff]   ;;  %v2127_v57 = vld [vmem:[#allocation4 + $0x1a0] ss:$8 sps:$4 sm:$0xff]  }
  0x44   :  { %v2072_v20 = vld [vmem:[#allocation4 + $0x34] ss:$8 sps:$4 sm:$0xff]  }
  0x45   :  { %508 = vmatpush1.bf16.msra.mxu0 %v1813_v59  ;;  %549 = vmatpush1.bf16.msra.mxu1 %v1815_v60  ;;  %v76_v59 = vld [vmem:[#allocation2 + $0x38] sm:$0xff]  ;;  %v1817_v60 = vcombine.low %v79_v47, %v83_v49  ;;  %v2117_v47 = vld [vmem:[#allocation4 + $0x1c4] ss:$8 sps:$4 sm:$0xff]   ;;  %v2115_v49 = vld [vmem:[#allocation4 + $0x1c0] ss:$8 sps:$4 sm:$0xff]  }
  0x46   :  { %509 = vmatprep.subr.bf16.mxu0 %v1806_v61  ;;  %550 = vmatprep.subr.bf16.mxu1 %v1808_v63  ;;  %v1819_v61 = vcombine.low %v80_v50, %v84_v51  ;;  %v1812_v63 = vcombine.high %v72_v58, %v76_v59  ;;  %v2084_v27 = vld [vmem:[#allocation4 + $0x14] ss:$8 sps:$4 sm:$0xff]  }
  0x47   :  { %v2087_v28 = vld [vmem:[#allocation4 + $0x114] ss:$8 sps:$4 sm:$0xff]  }
  0x48   :  { %v2108_v42 = vld [vmem:[#allocation4 + $0xd4] ss:$8 sps:$4 sm:$0xff]  }
  0x49   :  { %510 = vmatpush1.bf16.msra.mxu0 %v1805_v4  ;;  %551 = vmatpush1.bf16.msra.mxu1 %v1807_v5  ;;  %v1811_v4 = vcombine.low %v72_v58, %v76_v59  ;;  %v2046_v5 = vld [vmem:[#allocation4 + $0x70] ss:$8 sps:$4 sm:$0xff]   ;;  %v2111_v43 = vld [vmem:[#allocation4 + $0x1d4] ss:$8 sps:$4 sm:$0xff]  }
  0x4a   :  { %577 = vmatprep.subr.bf16.mxu0 %v1866_v6  ;;  %618 = vmatprep.subr.bf16.mxu1 %v1868_v8  ;;  %v2049_v6 = vld [vmem:[#allocation4 + $0x170] ss:$8 sps:$4 sm:$0xff]   ;;  %v2057_v8 = vld [vmem:[#allocation4 + $0x164] ss:$8 sps:$4 sm:$0xff]   ;;  %v2120_v50 = vld [vmem:[#allocation4 + $0xb4] ss:$8 sps:$4 sm:$0xff]  }
  0x4b   :  { %v2123_v51 = vld [vmem:[#allocation4 + $0x1b4] ss:$8 sps:$4 sm:$0xff]  }
  0x4c   :  { %528 = vmatmul.mubr.bf16.vlgmr.msra.gmra.mxu0 %v2382_v12  ;;  %569 = vmatmul.mubr.bf16.vlgmr.msra.gmra.mxu1 %v2382_v12  ;;  %v2132_v58 = vld [vmem:[#allocation4 + $0x94] ss:$8 sps:$4 sm:$0xff]  }
  0x4d   :  { %578 = vmatpush1.bf16.msra.mxu0 %v1865_v13  ;;  %619 = vmatpush1.bf16.msra.mxu1 %v1867_v14  ;;  %v2063_v13 = vld [vmem:[#allocation4 + $0x154] ss:$8 sps:$4 sm:$0xff]   ;;  %v2058_v14 = vld [vmem:[#allocation4 + $0x50] ss:$8 sps:$4 sm:$0xff]  }
  0x4e   :  { %579 = vmatprep.subr.bf16.mxu0 %v1858_v15  ;;  %620 = vmatprep.subr.bf16.mxu1 %v1860_v17  ;;  %v2061_v15 = vld [vmem:[#allocation4 + $0x150] ss:$8 sps:$4 sm:$0xff]   ;;  %v2069_v17 = vld [vmem:[#allocation4 + $0x144] ss:$8 sps:$4 sm:$0xff]   ;;  %v2135_v59 = vld [vmem:[#allocation4 + $0x194] ss:$8 sps:$4 sm:$0xff]  }
  0x4f   :  { %609 = vmatprep.mubr.bf16.mxu0 %v2327_v0  ;;  %650 = vmatprep.mubr.bf16.mxu1 %v2327_v0  ;;  %v1836_v0 = vcombine.high %v96_v35, %v100_v36  ;;  %v2096_v35 = vld [vmem:[#allocation4 + $0xf4] ss:$8 sps:$4 sm:$0xff]  }
  0x50   :  { %v2099_v36 = vld [vmem:[#allocation4 + $0x1f4] ss:$8 sps:$4 sm:$0xff]  }
  0x51   :  { %580 = vmatpush1.bf16.msra.mxu0 %v1857_v21  ;;  %621 = vmatpush1.bf16.msra.mxu1 %v1859_v22  ;;  %v2075_v21 = vld [vmem:[#allocation4 + $0x134] ss:$8 sps:$4 sm:$0xff]   ;;  %v2073_v22 = vld [vmem:[#allocation4 + $0x130] ss:$8 sps:$4 sm:$0xff]  }
  0x52   :  { %581 = vmatprep.subr.bf16.mxu0 %v1850_v23  ;;  %622 = vmatprep.subr.bf16.mxu1 %v1852_v25  ;;  %v2078_v23 = vld [vmem:[#allocation4 + $0x24] ss:$8 sps:$4 sm:$0xff]   ;;  %v2076_v25 = vld [vmem:[#allocation4 + $0x20] ss:$8 sps:$4 sm:$0xff]  }
  0x55   :  { %582 = vmatpush1.bf16.msra.mxu0 %v1849_v29  ;;  %623 = vmatpush1.bf16.msra.mxu1 %v1851_v30  ;;  %v2082_v29 = vld [vmem:[#allocation4 + $0x10] ss:$8 sps:$4 sm:$0xff]  }
  0x56   :  { %583 = vmatprep.subr.bf16.mxu0 %v1842_v31  ;;  %624 = vmatprep.subr.bf16.mxu1 %v1844_v33  ;;  %v2085_v30 = vld [vmem:[#allocation4 + $0x110] ss:$8 sps:$4 sm:$0xff]   ;;  %v2090_v31 = vld [vmem:[#allocation4 + $0x4] ss:$8 sps:$4 sm:$0xff]   ;;  %v2088_v33 = vld [vmem:[#allocation4] ss:$8 sps:$4 sm:$0xff]  }
  0x59   :  { %584 = vmatpush1.bf16.msra.mxu0 %v1841_v37  ;;  %625 = vmatpush1.bf16.msra.mxu1 %v1843_v38  ;;  %v2094_v37 = vld [vmem:[#allocation4 + $0xf0] ss:$8 sps:$4 sm:$0xff]  }
  0x5a   :  { %585 = vmatprep.subr.bf16.mxu0 %v1834_v39  ;;  %626 = vmatprep.subr.bf16.mxu1 %v1836_v0  ;;  %v2097_v38 = vld [vmem:[#allocation4 + $0x1f0] ss:$8 sps:$4 sm:$0xff]   ;;  %v2102_v39 = vld [vmem:[#allocation4 + $0xe4] ss:$8 sps:$4 sm:$0xff]   ;;  %v2100_v0 = vld [vmem:[#allocation4 + $0xe0] ss:$8 sps:$4 sm:$0xff]  }
  0x5d   :  { %586 = vmatpush1.bf16.msra.mxu0 %v1833_v44  ;;  %627 = vmatpush1.bf16.msra.mxu1 %v1835_v45  ;;  %v2106_v44 = vld [vmem:[#allocation4 + $0xd0] ss:$8 sps:$4 sm:$0xff]  }
  0x5e   :  { %587 = vmatprep.subr.bf16.mxu0 %v1826_v46  ;;  %628 = vmatprep.subr.bf16.mxu1 %v1828_v48  ;;  %v2109_v45 = vld [vmem:[#allocation4 + $0x1d0] ss:$8 sps:$4 sm:$0xff]   ;;  %v2114_v46 = vld [vmem:[#allocation4 + $0xc4] ss:$8 sps:$4 sm:$0xff]   ;;  %v2112_v48 = vld [vmem:[#allocation4 + $0xc0] ss:$8 sps:$4 sm:$0xff]  }
  0x61   :  { %588 = vmatpush1.bf16.msra.mxu0 %v1825_v52  ;;  %629 = vmatpush1.bf16.msra.mxu1 %v1827_v53  ;;  %v2118_v52 = vld [vmem:[#allocation4 + $0xb0] ss:$8 sps:$4 sm:$0xff]  }
  0x62   :  { %589 = vmatprep.subr.bf16.mxu0 %v1818_v54  ;;  %630 = vmatprep.subr.bf16.mxu1 %v1820_v56  ;;  %v2121_v53 = vld [vmem:[#allocation4 + $0x1b0] ss:$8 sps:$4 sm:$0xff]   ;;  %v2126_v54 = vld [vmem:[#allocation4 + $0xa4] ss:$8 sps:$4 sm:$0xff]   ;;  %v2124_v56 = vld [vmem:[#allocation4 + $0xa0] ss:$8 sps:$4 sm:$0xff]  }
  0x65   :  { %590 = vmatpush1.bf16.msra.mxu0 %v1817_v60  ;;  %631 = vmatpush1.bf16.msra.mxu1 %v1819_v61  ;;  %v2130_v60 = vld [vmem:[#allocation4 + $0x90] ss:$8 sps:$4 sm:$0xff]  }
  0x66   :  { %591 = vmatprep.subr.bf16.mxu0 %v1810_v62  ;;  %632 = vmatprep.subr.bf16.mxu1 %v1812_v63  ;;  %v2133_v61 = vld [vmem:[#allocation4 + $0x190] ss:$8 sps:$4 sm:$0xff]   ;;  %v2138_v62 = vld [vmem:[#allocation4 + $0x84] ss:$8 sps:$4 sm:$0xff]  }
  0x67   :  { %v2141_v63 = vld [vmem:[#allocation4 + $0x184] ss:$8 sps:$4 sm:$0xff]  }
  0x69   :  { %592 = vmatpush1.bf16.msra.mxu0 %v1809_v2  ;;  %633 = vmatpush1.bf16.msra.mxu1 %v1811_v4  ;;  %v2139_v2 = vld [vmem:[#allocation4 + $0x180] ss:$8 sps:$4 sm:$0xff]   ;;  %v2147_v4 = vld [vmem:[#allocation4 + $0x374] ss:$8 sps:$4 sm:$0xff]  }
  0x6a   :  { %1455 = vmatprep.subr.bf16.mxu0 %v2048_v1  ;;  %1496 = vmatprep.subr.bf16.mxu1 %v2051_v3  ;;  %v2136_v1 = vld [vmem:[#allocation4 + $0x80] ss:$8 sps:$4 sm:$0xff]   ;;  %v2144_v3 = vld [vmem:[#allocation4 + $0x274] ss:$8 sps:$4 sm:$0xff]  }
  0x6c   :  { %610 = vmatmul.mubr.bf16.vlgmr.msra.gmra.mxu0 %v2382_v12  ;;  %651 = vmatmul.mubr.bf16.vlgmr.msra.gmra.mxu1 %v2382_v12  ;;  %v2070_v12 = vld [vmem:[#allocation4 + $0x30] ss:$8 sps:$4 sm:$0xff]  }
  0x6d   :  { %1456 = vmatpush1.bf16.msra.mxu0 %v2046_v5  ;;  %1497 = vmatpush1.bf16.msra.mxu1 %v2049_v6  ;;  %v135_v5 = vlaneseq }
  0x6e   :  { %1457 = vmatprep.subr.bf16.mxu0 %v2054_v7  ;;  %1498 = vmatprep.subr.bf16.mxu1 %v2057_v8  ;;  %v2396_v8 = vld [vmem:[%s2438_s2] sm:$0xff] }
  0x6f   :  { %v2390_v6 = vshrl.u32 %v135_v5, 7 }
  0x71   :  { %1458 = vmatpush1.bf16.msra.mxu0 %v2052_v9  ;;  %1499 = vmatpush1.bf16.msra.mxu1 %v2055_v10  ;;  %v137_v7 = vsub.s32 0, %v2390_v6  ;;  %v145_v9 = vsub.s32 2, %v2390_v6  ;;  %v141_v10 = vsub.s32 1, %v2390_v6 }
  0x72   :  { %1459 = vmatprep.subr.bf16.mxu0 %v2060_v11  ;;  %1500 = vmatprep.subr.bf16.mxu1 %v2063_v13  ;;  %v149_v11 = vsub.s32 3, %v2390_v6 }
  0x73   :  { %v138_v13 = vrot.slane %v2396_v8, %v137_v7 }
  0x75   :  { %1460 = vmatpush1.bf16.msra.mxu0 %v2058_v14  ;;  %1501 = vmatpush1.bf16.msra.mxu1 %v2061_v15  ;;  %v146_v14 = vrot.slane %v2396_v8, %v145_v9  ;;  %v142_v15 = vrot.slane %v2396_v8, %v141_v10 }
  0x76   :  { %1461 = vmatprep.subr.bf16.mxu0 %v2066_v16  ;;  %1502 = vmatprep.subr.bf16.mxu1 %v2069_v17  ;;  %v150_v17 = vrot.slane %v2396_v8, %v149_v11  ;;  %v2184_v11 = vld [vmem:[#allocation4 + $0x200] ss:$8 sps:$4 sm:$0xff]  }
  0x79   :  { %1462 = vmatpush1.bf16.msra.mxu0 %v2064_v18  ;;  %1503 = vmatpush1.bf16.msra.mxu1 %v2067_v19 }
  0x7a   :  { %1463 = vmatprep.subr.bf16.mxu0 %v2072_v20  ;;  %1504 = vmatprep.subr.bf16.mxu1 %v2075_v21 }
  0x7d   :  { %1464 = vmatpush1.bf16.msra.mxu0 %v2070_v12  ;;  %1505 = vmatpush1.bf16.msra.mxu1 %v2073_v22 }
  0x7e   :  { %1465 = vmatprep.subr.bf16.mxu0 %v2078_v23  ;;  %1506 = vmatprep.subr.bf16.mxu1 %v2081_v24 }
  0x81   :  { %1466 = vmatpush1.bf16.msra.mxu0 %v2076_v25  ;;  %1507 = vmatpush1.bf16.msra.mxu1 %v2079_v26 }
  0x82   :  { %1467 = vmatprep.subr.bf16.mxu0 %v2084_v27  ;;  %1508 = vmatprep.subr.bf16.mxu1 %v2087_v28 }
  0x85   :  { %1468 = vmatpush1.bf16.msra.mxu0 %v2082_v29  ;;  %1509 = vmatpush1.bf16.msra.mxu1 %v2085_v30 }
  0x86   :  { %1469 = vmatprep.subr.bf16.mxu0 %v2090_v31  ;;  %1510 = vmatprep.subr.bf16.mxu1 %v2093_v32 }
  0x89   :  { %1470 = vmatpush1.bf16.msra.mxu0 %v2088_v33  ;;  %1511 = vmatpush1.bf16.msra.mxu1 %v2091_v34  ;;  %v2142_v34 = vld [vmem:[#allocation4 + $0x270] ss:$8 sps:$4 sm:$0xff]  }
  0x8a   :  { %1471 = vmatprep.subr.bf16.mxu0 %v2096_v35  ;;  %1512 = vmatprep.subr.bf16.mxu1 %v2099_v36 }
  0x8d   :  { %1472 = vmatpush2.bf16.msra.mxu0 %v2094_v37  ;;  %1513 = vmatpush2.bf16.msra.mxu1 %v2097_v38  ;;  %v2145_v37 = vld [vmem:[#allocation4 + $0x370] ss:$8 sps:$4 sm:$0xff]   ;;  %v2150_v38 = vld [vmem:[#allocation4 + $0x264] ss:$8 sps:$4 sm:$0xff]  }
  0x8e   :  { %1473 = vmatprep.subr.bf16.mxu0 %v2102_v39  ;;  %1514 = vmatprep.subr.bf16.mxu1 %v2105_v40  ;;  %v2153_v39 = vld [vmem:[#allocation4 + $0x364] ss:$8 sps:$4 sm:$0xff]   ;;  %v2148_v40 = vld [vmem:[#allocation4 + $0x260] ss:$8 sps:$4 sm:$0xff]  }
  0x91   :  { %1474 = vmatpush2.bf16.msra.mxu0 %v2100_v0  ;;  %1515 = vmatpush2.bf16.msra.mxu1 %v2103_v41  ;;  %v2151_v0 = vld [vmem:[#allocation4 + $0x360] ss:$8 sps:$4 sm:$0xff]   ;;  %v2156_v41 = vld [vmem:[#allocation4 + $0x254] ss:$8 sps:$4 sm:$0xff]  }
  0x92   :  { %1475 = vmatprep.subr.bf16.mxu0 %v2108_v42  ;;  %1516 = vmatprep.subr.bf16.mxu1 %v2111_v43  ;;  %v2159_v42 = vld [vmem:[#allocation4 + $0x354] ss:$8 sps:$4 sm:$0xff]   ;;  %v2154_v43 = vld [vmem:[#allocation4 + $0x250] ss:$8 sps:$4 sm:$0xff]  }
  0x95   :  { %1476 = vmatpush2.bf16.msra.mxu0 %v2106_v44  ;;  %1517 = vmatpush2.bf16.msra.mxu1 %v2109_v45  ;;  %v2157_v44 = vld [vmem:[#allocation4 + $0x350] ss:$8 sps:$4 sm:$0xff]   ;;  %v2162_v45 = vld [vmem:[#allocation4 + $0x244] ss:$8 sps:$4 sm:$0xff]  }
  0x96   :  { %1477 = vmatprep.subr.bf16.mxu0 %v2114_v46  ;;  %1518 = vmatprep.subr.bf16.mxu1 %v2117_v47  ;;  %v2165_v46 = vld [vmem:[#allocation4 + $0x344] ss:$8 sps:$4 sm:$0xff]   ;;  %v2160_v47 = vld [vmem:[#allocation4 + $0x240] ss:$8 sps:$4 sm:$0xff]  }
  0x99   :  { %1478 = vmatpush2.bf16.msra.mxu0 %v2112_v48  ;;  %1519 = vmatpush2.bf16.msra.mxu1 %v2115_v49  ;;  %v2163_v48 = vld [vmem:[#allocation4 + $0x340] ss:$8 sps:$4 sm:$0xff]   ;;  %v2168_v49 = vld [vmem:[#allocation4 + $0x234] ss:$8 sps:$4 sm:$0xff]  }
  0x9a   :  { %1479 = vmatprep.subr.bf16.mxu0 %v2120_v50  ;;  %1520 = vmatprep.subr.bf16.mxu1 %v2123_v51  ;;  %v2171_v50 = vld [vmem:[#allocation4 + $0x334] ss:$8 sps:$4 sm:$0xff]   ;;  %v2166_v51 = vld [vmem:[#allocation4 + $0x230] ss:$8 sps:$4 sm:$0xff]  }
  0x9d   :  { %1480 = vmatpush2.bf16.msra.mxu0 %v2118_v52  ;;  %1521 = vmatpush2.bf16.msra.mxu1 %v2121_v53  ;;  %v2169_v52 = vld [vmem:[#allocation4 + $0x330] ss:$8 sps:$4 sm:$0xff]   ;;  %v2174_v53 = vld [vmem:[#allocation4 + $0x224] ss:$8 sps:$4 sm:$0xff]  }
  0x9e   :  { %1481 = vmatprep.subr.bf16.mxu0 %v2126_v54  ;;  %1522 = vmatprep.subr.bf16.mxu1 %v2129_v55  ;;  %v2177_v54 = vld [vmem:[#allocation4 + $0x324] ss:$8 sps:$4 sm:$0xff]   ;;  %v2172_v55 = vld [vmem:[#allocation4 + $0x220] ss:$8 sps:$4 sm:$0xff]  }
  0xa1   :  { %1482 = vmatpush2.bf16.msra.mxu0 %v2124_v56  ;;  %1523 = vmatpush2.bf16.msra.mxu1 %v2127_v57  ;;  %v157_v56 = vsub.s32 5, %v2390_v6  ;;  %v2175_v57 = vld [vmem:[#allocation4 + $0x320] ss:$8 sps:$4 sm:$0xff]  }
  0xa2   :  { %1483 = vmatprep.subr.bf16.mxu0 %v2132_v58  ;;  %1524 = vmatprep.subr.bf16.mxu1 %v2135_v59  ;;  %v2180_v58 = vld [vmem:[#allocation4 + $0x214] ss:$8 sps:$4 sm:$0xff]   ;;  %v165_v59 = vsub.s32 7, %v2390_v6 }
  0xa5   :  { %1484 = vmatpush2.bf16.msra.mxu0 %v2130_v60  ;;  %1525 = vmatpush2.bf16.msra.mxu1 %v2133_v61  ;;  %v2183_v60 = vld [vmem:[#allocation4 + $0x314] ss:$8 sps:$4 sm:$0xff]   ;;  %v2178_v61 = vld [vmem:[#allocation4 + $0x210] ss:$8 sps:$4 sm:$0xff]  }
  0xa6   :  { %1485 = vmatprep.subr.bf16.mxu0 %v2138_v62  ;;  %1526 = vmatprep.subr.bf16.mxu1 %v2141_v63  ;;  %v158_v62 = vrot.slane %v2396_v8, %v157_v56  ;;  %v2181_v63 = vld [vmem:[#allocation4 + $0x310] ss:$8 sps:$4 sm:$0xff]  }
  0xa7   :  { %v2229_v56 = vld [vmem:[#allocation4 + $0x390] ss:$8 sps:$4 sm:$0xff]  }
  0xa9   :  { %1486 = vmatpush2.bf16.msra.mxu0 %v2136_v1  ;;  %1527 = vmatpush2.bf16.msra.mxu1 %v2139_v2  ;;  %v2186_v1 = vld [vmem:[#allocation4 + $0x204] ss:$8 sps:$4 sm:$0xff]  }
  0xaa   :  { %1537 = vmatprep.subr.bf16.mxu0 %v2144_v3  ;;  %1578 = vmatprep.subr.bf16.mxu1 %v2147_v4  ;;  %v166_v3 = vrot.slane %v2396_v8, %v165_v59  ;;  %v2189_v4 = vld [vmem:[#allocation4 + $0x304] ss:$8 sps:$4 sm:$0xff]  }
 0x10c   :  { %v529_v16 = vpop.f32.mrf.mxu0  ;;  %v570_v19 = vpop.f32.mrf.mxu1 }
 0x10d   :  { %v530_v18 = vadd.f32 %v529_v16, %v138_v13  ;;  %v571_v20 = vadd.f32 %v570_v19, %v146_v14  ;;  %v2192_v16 = vld [vmem:[#allocation4 + $0x2f4] ss:$8 sps:$4 sm:$0xff]  }
 0x10e   :  { %v531_v21 = vpop.f32.mrf.mxu0  ;;  %v572_v22 = vpop.f32.mrf.mxu1  ;;  %v2195_v19 = vld [vmem:[#allocation4 + $0x3f4] ss:$8 sps:$4 sm:$0xff]  }
 0x10f   :  { %v532_v12 = vadd.f32 %v531_v21, %v142_v15  ;;  %v659_v23 = vmax.f32 %v530_v18, 0.0  ;;  %v661_v24 = vmax.f32 %v571_v20, 0.0  ;;  %v573_v25 = vadd.f32 %v572_v22, %v150_v17  ;;  %v2187_v15 = vld [vmem:[#allocation4 + $0x300] ss:$8 sps:$4 sm:$0xff]  }
 0x110   :  { %v533_v26 = vpop.f32.mrf.mxu0  ;;  %v574_v28 = vpop.f32.mrf.mxu1 }
 0x111   :  { %v660_v27 = vmax.f32 %v532_v12, 0.0  ;;  %v662_v29 = vmax.f32 %v573_v25, 0.0  ;;  %v669_v31 = vpack.c.bf16 %v661_v24, %v661_v24  ;;  %v667_v35 = vpack.c.bf16 %v659_v23, %v659_v23  ;;  %v2190_v23 = vld [vmem:[#allocation4 + $0x2f0] ss:$8 sps:$4 sm:$0xff]  }
 0x112   :  { %v534_v30 = vpop.f32.mrf.mxu0  ;;  %v575_v33 = vpop.f32.mrf.mxu1  ;;  %v2193_v26 = vld [vmem:[#allocation4 + $0x3f0] ss:$8 sps:$4 sm:$0xff]  }
 0x113   :  { %v668_v32 = vpack.c.bf16 %v660_v27, %v660_v27  ;;  %v670_v36 = vpack.c.bf16 %v662_v29, %v662_v29  ;;  %v2198_v27 = vld [vmem:[#allocation4 + $0x2e4] ss:$8 sps:$4 sm:$0xff]   ;;  %v2196_v30 = vld [vmem:[#allocation4 + $0x2e0] ss:$8 sps:$4 sm:$0xff]   ;;  %v2207_v33 = vld [vmem:[#allocation4 + $0x3d4] ss:$8 sps:$4 sm:$0xff]  }
 0x114   :  { %v2201_v29 = vld [vmem:[#allocation4 + $0x3e4] ss:$8 sps:$4 sm:$0xff]  }
 0x115   :  { %1487 = vmatprep.mubr.bf16.mxu0 %v668_v32  ;;  %1528 = vmatprep.mubr.bf16.mxu1 %v670_v36  ;;  %v2204_v32 = vld [vmem:[#allocation4 + $0x2d4] ss:$8 sps:$4 sm:$0xff]   ;;  %v2210_v36 = vld [vmem:[#allocation4 + $0x2c4] ss:$8 sps:$4 sm:$0xff]  }
 0x116   :  { %1488 = vmatmul.mubr.bf16.vlgmr.msra.gmra.mxu0 %v667_v35  ;;  %1529 = vmatmul.mubr.bf16.vlgmr.msra.gmra.mxu1 %v669_v31  ;;  %v2199_v31 = vld [vmem:[#allocation4 + $0x3e0] ss:$8 sps:$4 sm:$0xff]   ;;  %v2205_v35 = vld [vmem:[#allocation4 + $0x3d0] ss:$8 sps:$4 sm:$0xff]  }
 0x117   :  { %1538 = vmatpush1.bf16.msra.mxu0 %v2142_v34  ;;  %1579 = vmatpush1.bf16.msra.mxu1 %v2145_v37  ;;  %v2202_v34 = vld [vmem:[#allocation4 + $0x2d0] ss:$8 sps:$4 sm:$0xff]   ;;  %v2213_v37 = vld [vmem:[#allocation4 + $0x3c4] ss:$8 sps:$4 sm:$0xff]  }
 0x118   :  { %1539 = vmatprep.subr.bf16.mxu0 %v2150_v38  ;;  %1580 = vmatprep.subr.bf16.mxu1 %v2153_v39  ;;  %v2208_v38 = vld [vmem:[#allocation4 + $0x2c0] ss:$8 sps:$4 sm:$0xff]  }
 0x119   :  { %v2211_v39 = vld [vmem:[#allocation4 + $0x3c0] ss:$8 sps:$4 sm:$0xff]  }
 0x11b   :  { %1540 = vmatpush1.bf16.msra.mxu0 %v2148_v40  ;;  %1581 = vmatpush1.bf16.msra.mxu1 %v2151_v0  ;;  %v2216_v40 = vld [vmem:[#allocation4 + $0x2b4] ss:$8 sps:$4 sm:$0xff]  }
 0x11c   :  { %1541 = vmatprep.subr.bf16.mxu0 %v2156_v41  ;;  %1582 = vmatprep.subr.bf16.mxu1 %v2159_v42  ;;  %v2219_v0 = vld [vmem:[#allocation4 + $0x3b4] ss:$8 sps:$4 sm:$0xff]   ;;  %v2214_v41 = vld [vmem:[#allocation4 + $0x2b0] ss:$8 sps:$4 sm:$0xff]   ;;  %v161_v42 = vsub.s32 6, %v2390_v6 }
 0x11f   :  { %1542 = vmatpush1.bf16.msra.mxu0 %v2154_v43  ;;  %1583 = vmatpush1.bf16.msra.mxu1 %v2157_v44  ;;  %v153_v43 = vsub.s32 4, %v2390_v6  ;;  %v2217_v44 = vld [vmem:[#allocation4 + $0x3b0] ss:$8 sps:$4 sm:$0xff]  }
 0x120   :  { %1543 = vmatprep.subr.bf16.mxu0 %v2162_v45  ;;  %1584 = vmatprep.subr.bf16.mxu1 %v2165_v46  ;;  %v2222_v45 = vld [vmem:[#allocation4 + $0x2a4] ss:$8 sps:$4 sm:$0xff]  }
 0x121   :  { %v2225_v46 = vld [vmem:[#allocation4 + $0x3a4] ss:$8 sps:$4 sm:$0xff]  }
 0x123   :  { %1544 = vmatpush1.bf16.msra.mxu0 %v2160_v47  ;;  %1585 = vmatpush1.bf16.msra.mxu1 %v2163_v48  ;;  %v162_v47 = vrot.slane %v2396_v8, %v161_v42  ;;  %v2220_v48 = vld [vmem:[#allocation4 + $0x2a0] ss:$8 sps:$4 sm:$0xff]  }
 0x124   :  { %1545 = vmatprep.subr.bf16.mxu0 %v2168_v49  ;;  %1586 = vmatprep.subr.bf16.mxu1 %v2171_v50  ;;  %v154_v49 = vrot.slane %v2396_v8, %v153_v43  ;;  %v2223_v50 = vld [vmem:[#allocation4 + $0x3a0] ss:$8 sps:$4 sm:$0xff]  }
 0x125   :  { %v2232_v8 = vld [vmem:[#allocation4 + $0x280] ss:$8 sps:$4 sm:$0xff]  }
 0x127   :  { %1546 = vmatpush1.bf16.msra.mxu0 %v2166_v51  ;;  %1587 = vmatpush1.bf16.msra.mxu1 %v2169_v52  ;;  %v2228_v51 = vld [vmem:[#allocation4 + $0x294] ss:$8 sps:$4 sm:$0xff]  }
 0x128   :  { %1547 = vmatprep.subr.bf16.mxu0 %v2174_v53  ;;  %1588 = vmatprep.subr.bf16.mxu1 %v2177_v54  ;;  %v2231_v52 = vld [vmem:[#allocation4 + $0x394] ss:$8 sps:$4 sm:$0xff]   ;;  %v2226_v54 = vld [vmem:[#allocation4 + $0x290] ss:$8 sps:$4 sm:$0xff]  }
 0x12b   :  { %1548 = vmatpush1.bf16.msra.mxu0 %v2172_v55  ;;  %1589 = vmatpush1.bf16.msra.mxu1 %v2175_v57  ;;  %v2234_v57 = vld [vmem:[#allocation4 + $0x284] ss:$8 sps:$4 sm:$0xff]  }
 0x12c   :  { %1549 = vmatprep.subr.bf16.mxu0 %v2180_v58  ;;  %v2412_v2 = vpop.f32.mrf.mxu0  ;;  %1590 = vmatprep.subr.bf16.mxu1 %v2183_v60  ;;  %v2415_v5 = vpop.f32.mrf.mxu1  ;;  %v2237_v58 = vld [vmem:[#allocation4 + $0x384] ss:$8 sps:$4 sm:$0xff]  }
 0x12d   :  { %v653_v53 = vadd.f32 %v2415_v5, %v162_v47  ;;  %v612_v55 = vadd.f32 %v2412_v2, %v154_v49  ;;  %v2239_v2 = vld [vmem:[#allocation6 + $0x38] sm:$0xff]   ;;  %v2242_v5 = vld [vmem:[#allocation6 + $0x68] sm:$0xff]   ;;  %v1997_v49 = vld [vmem:[%s2442_s6] ss:$0 sm:$0xff] }
 0x12e   :  { %v613_v9 = vpop.f32.mrf.mxu0  ;;  %v654_v14 = vpop.f32.mrf.mxu1 }
 0x12f   :  { %1550 = vmatpush1.bf16.msra.mxu0 %v2178_v61  ;;  %v614_v13 = vadd.f32 %v613_v9, %v158_v62  ;;  %1591 = vmatpush1.bf16.msra.mxu1 %v2181_v63  ;;  %v655_v18 = vadd.f32 %v654_v14, %v166_v3  ;;  %v665_v59 = vmax.f32 %v653_v53, 0.0  ;;  %v663_v60 = vmax.f32 %v612_v55, 0.0  ;;  %v2235_v61 = vld [vmem:[#allocation4 + $0x380] ss:$8 sps:$4 sm:$0xff]   ;;  %v2240_v3 = vld [vmem:[#allocation6 + $0x70] sm:$0xff]   ;;  %v2246_v14 = vld [vmem:[#allocation6 + $0x58] sm:$0xff]  }
 0x130   :  { %1551 = vmatprep.subr.bf16.mxu0 %v2186_v1  ;;  %v615_v17 = vpop.f32.mrf.mxu0  ;;  %1592 = vmatprep.subr.bf16.mxu1 %v2189_v4  ;;  %v656_v21 = vpop.f32.mrf.mxu1  ;;  %v2238_v1 = vld [vmem:[#allocation6 + $0x78] sm:$0xff]   ;;  %v2241_v4 = vld [vmem:[#allocation6 + $0x30] sm:$0xff]   ;;  %v2243_v9 = vld [vmem:[#allocation6 + $0x28] sm:$0xff]  }
 0x131   :  { %v664_v20 = vmax.f32 %v614_v13, 0.0  ;;  %v666_v12 = vmax.f32 %v655_v18, 0.0  ;;  %v673_v62 = vpack.c.bf16 %v665_v59, %v665_v59  ;;  %v671_v63 = vpack.c.bf16 %v663_v60, %v663_v60  ;;  %v2245_v13 = vld [vmem:[#allocation6 + $0x20] sm:$0xff]   ;;  %v2249_v17 = vld [vmem:[#allocation6 + $0x10] sm:$0xff]   ;;  %v2250_v18 = vld [vmem:[#allocation6 + $0x48] sm:$0xff]  }
 0x132   :  { %v616_v22 = vpop.f32.mrf.mxu0  ;;  %v657_v25 = vpop.f32.mrf.mxu1  ;;  %v2253_v21 = vld [vmem:[#allocation6] sm:$0xff]  }
 0x133   :  { %1552 = vmatpush1.bf16.msra.mxu0 %v2184_v11  ;;  %v672_v24 = vpack.c.bf16 %v664_v20, %v664_v20  ;;  %1593 = vmatpush1.bf16.msra.mxu1 %v2187_v15  ;;  %v674_v28 = vpack.c.bf16 %v666_v12, %v666_v12  ;;  %v2244_v11 = vld [vmem:[#allocation6 + $0x60] sm:$0xff]   ;;  %v2247_v15 = vld [vmem:[#allocation6 + $0x18] sm:$0xff]  }
 0x134   :  { %1553 = vmatprep.subr.bf16.mxu0 %v2192_v16  ;;  %1594 = vmatprep.subr.bf16.mxu1 %v2195_v19  ;;  %v2248_v16 = vld [vmem:[#allocation6 + $0x50] sm:$0xff]   ;;  %v2251_v19 = vld [vmem:[#allocation6 + $0x8] sm:$0xff]   ;;  %v2252_v20 = vld [vmem:[#allocation6 + $0x40] sm:$0xff]  }
 0x135   :  { %1569 = vmatprep.mubr.bf16.mxu0 %v672_v24  ;;  %1610 = vmatprep.mubr.bf16.mxu1 %v674_v28 }
 0x137   :  { %1554 = vmatpush2.bf16.msra.mxu0 %v2190_v23  ;;  %1595 = vmatpush2.bf16.msra.mxu1 %v2193_v26 }
 0x138   :  { %1555 = vmatprep.subr.bf16.mxu0 %v2198_v27  ;;  %1596 = vmatprep.subr.bf16.mxu1 %v2201_v29  ;;  %v803_v29 = vld [vmem:[%s2440_s4] sm:$0x3] }
 0x13b   :  { %1556 = vmatpush2.bf16.msra.mxu0 %v2196_v30  ;;  %1597 = vmatpush2.bf16.msra.mxu1 %v2199_v31  ;;  %v808_v30 = vrot.slane %v803_v29, %v137_v7  ;;  %v812_v31 = vrot.slane %v803_v29, %v141_v10 }
 0x13c   :  { %1557 = vmatprep.subr.bf16.mxu0 %v2204_v32  ;;  %1598 = vmatprep.subr.bf16.mxu1 %v2207_v33 }
 0x13f   :  { %1558 = vmatpush2.bf16.msra.mxu0 %v2202_v34  ;;  %1599 = vmatpush2.bf16.msra.mxu1 %v2205_v35 }
 0x140   :  { %1559 = vmatprep.subr.bf16.mxu0 %v2210_v36  ;;  %1600 = vmatprep.subr.bf16.mxu1 %v2213_v37 }
 0x143   :  { %1560 = vmatpush2.bf16.msra.mxu0 %v2208_v38  ;;  %1601 = vmatpush2.bf16.msra.mxu1 %v2211_v39 }
 0x144   :  { %1561 = vmatprep.subr.bf16.mxu0 %v2216_v40  ;;  %1602 = vmatprep.subr.bf16.mxu1 %v2219_v0 }
 0x147   :  { %1562 = vmatpush2.bf16.msra.mxu0 %v2214_v41  ;;  %1603 = vmatpush2.bf16.msra.mxu1 %v2217_v44 }
 0x148   :  { %1563 = vmatprep.subr.bf16.mxu0 %v2222_v45  ;;  %1604 = vmatprep.subr.bf16.mxu1 %v2225_v46 }
 0x14b   :  { %1564 = vmatpush2.bf16.msra.mxu0 %v2220_v48  ;;  %1605 = vmatpush2.bf16.msra.mxu1 %v2223_v50 }
 0x14c   :  { %1565 = vmatprep.subr.bf16.mxu0 %v2228_v51  ;;  %1606 = vmatprep.subr.bf16.mxu1 %v2231_v52 }
 0x14f   :  { %1566 = vmatpush2.bf16.msra.mxu0 %v2226_v54  ;;  %1607 = vmatpush2.bf16.msra.mxu1 %v2229_v56 }
 0x150   :  { %1567 = vmatprep.subr.bf16.mxu0 %v2234_v57  ;;  %1608 = vmatprep.subr.bf16.mxu1 %v2237_v58 }
 0x153   :  { %1568 = vmatpush2.bf16.msra.mxu0 %v2232_v8  ;;  %1609 = vmatpush2.bf16.msra.mxu1 %v2235_v61 }
 0x154   :  { %2014 = vmatprep.subr.bf16.mxu0 %v2238_v1 }
 0x156   :  { %1570 = vmatmul.mubr.bf16.vlgmr.msra.gmra.mxu0 %v671_v63  ;;  %1611 = vmatmul.mubr.bf16.vlgmr.msra.gmra.mxu1 %v673_v62 }
 0x157   :  { %2015 = vmatpush3.bf16.msra.mxu0 %v2239_v2 }
 0x158   :  { %2016 = vmatprep.subr.bf16.mxu0 %v2240_v3 }
 0x15b   :  { %2017 = vmatpush3.bf16.msra.mxu0 %v2241_v4 }
 0x15c   :  { %2018 = vmatprep.subr.bf16.mxu0 %v2242_v5 }
 0x15f   :  { %2019 = vmatpush3.bf16.msra.mxu0 %v2243_v9 }
 0x160   :  { %2020 = vmatprep.subr.bf16.mxu0 %v2244_v11 }
 0x163   :  { %2021 = vmatpush3.bf16.msra.mxu0 %v2245_v13 }
 0x164   :  { %2022 = vmatprep.subr.bf16.mxu0 %v2246_v14 }
 0x167   :  { %2023 = vmatpush3.bf16.msra.mxu0 %v2247_v15 }
 0x168   :  { %2024 = vmatprep.subr.bf16.mxu0 %v2248_v16 }
 0x16b   :  { %2025 = vmatpush3.bf16.msra.mxu0 %v2249_v17 }
 0x16c   :  { %2026 = vmatprep.subr.bf16.mxu0 %v2250_v18 }
 0x16f   :  { %2027 = vmatpush3.bf16.msra.mxu0 %v2251_v19 }
 0x170   :  { %2028 = vmatprep.subr.bf16.mxu0 %v2252_v20 }
 0x173   :  { %2029 = vmatpush3.bf16.msra.mxu0 %v2253_v21 }
 0x1d6   :  { %v1489_v12 = vpop.f32.mrf.mxu0  ;;  %v1530_v22 = vpop.f32.mrf.mxu1 }
 0x1d7   :  { %v1490_v32 = vadd.f32 %v1489_v12, %v808_v30 }
 0x1d8   :  { %v1491_v23 = vpop.f32.mrf.mxu0  ;;  %v1532_v24 = vpop.f32.mrf.mxu1 }
 0x1d9   :  { %v1492_v33 = vadd.f32 %v1491_v23, %v812_v31  ;;  %v1531_v34 = vadd.f32 %v1530_v22, %v1490_v32 }
 0x1da   :  { %v1493_v25 = vpop.f32.mrf.mxu0  ;;  %v1534_v26 = vpop.f32.mrf.mxu1 }
 0x1db   :  { %v1533_v36 = vadd.f32 %v1532_v24, %v1492_v33 }
 0x1dc   :  { %v1494_v27 = vpop.f32.mrf.mxu0  ;;  %v1535_v28 = vpop.f32.mrf.mxu1 }
 0x216   :  { %v1571_v35 = vpop.f32.mrf.mxu0  ;;  %v1612_v38 = vpop.f32.mrf.mxu1 }
 0x217   :  { %v1572_v37 = vadd.f32 %v1571_v35, %v1531_v34 }
 0x218   :  { %v1573_v39 = vpop.f32.mrf.mxu0  ;;  %v1614_v41 = vpop.f32.mrf.mxu1 }
 0x219   :  { %v1613_v40 = vadd.f32 %v1612_v38, %v1572_v37  ;;  %v1574_v0 = vadd.f32 %v1573_v39, %v1533_v36 }
 0x21a   :  { %v1575_v42 = vpop.f32.mrf.mxu0  ;;  %v1616_v44 = vpop.f32.mrf.mxu1 }
 0x21b   :  { %v1615_v43 = vadd.f32 %v1614_v41, %v1574_v0  ;;  %v1619_v45 = vmax.f32 %v1613_v40, 0.0 }
 0x21c   :  { %v1576_v46 = vpop.f32.mrf.mxu0  ;;  %v1617_v47 = vpop.f32.mrf.mxu1 }
 0x21d   :  { %v1620_v7 = vmax.f32 %v1615_v43, 0.0  ;;  %v1621_v10 = vpack.c.bf16 %v1619_v45, %v1619_v45 }
 0x21f   :  { %v1622_v6 = vpack.c.bf16 %v1620_v7, %v1620_v7 }
 0x221   :  { %1790 = vmatprep.mubr.bf16.mxu0 %v1622_v6 }
 0x222   :  { %1791 = vmatmul.mubr.bf16.vlgmr.msra.gmra.mxu0 %v1621_v10 }
 0x2e2   :  { %v2030_v48 = vpop.f32.mrf.mxu0 }
 0x2e4   :  { %v2031_v50 = vpop.f32.mrf.mxu0 }
 0x2e5   :  { %v2032_v51 = vadd.f32 %v2031_v50, %v2030_v48 }
 0x2e6   :  { %v2033_v52 = vpop.f32.mrf.mxu0 }
 0x2e7   :  { %v1793_v53 = vadd.f32 %v2032_v51, %v1997_v49 }
 0x2e8   :  { %v2034_v54 = vpop.f32.mrf.mxu0 }
 0x2e9   :  { %1798 = vst [vmem:[%s2443_s7] sm:$0xff] %v1793_v53 }
 0x2ea   :  { %1803 = vsyncpa [#allocation3], 1 }
 0x2eb   :  { %1804 = vsyncpa [#allocation5], 1 }

</bundles_post_ra>
